<compile_context>
chip_gen: v6e
topology: v6e:2x2x1
jax: 0.10.0
libtpu: 0.0.40
codegen_flags: <defaults>
</compile_context>

<pallas_src>
import jax
import jax.numpy as jnp
from jax import lax
from jax.experimental import pallas as pl
from jax.experimental.pallas import tpu as pltpu

LANES = 128  # lane width; MLP feature dims are padded to this


def _round_up(x, m):
    return (x + m - 1) // m * m


# ----------------------------- Pallas kernel -------------------------------
def text_clf_kernel(tok_ref, bag_ref,                         # VMEM int32 token stream
                    emb_ref, w1_ref, b1_ref, w2_ref, b2_ref,  # VMEM weights/biases
                    w3_ref, b3_ref,
                    out_ref):                                 # VMEM output [tm, 128] f32
    tm = out_ref.shape[0]
    t_pad = bag_ref.shape[1]
    v_pad = emb_ref.shape[0]
    g0 = pl.program_id(0) * tm                                # first bag of this tile

    bag_ids = bag_ref[...]                                    # (1, t_pad) int32, -1 = pad
    tok_ids = tok_ref[...]                                    # (t_pad, 1) int32

    # Bag membership mask for this tile's bags (VPU iota + compare).
    row_iota = g0 + lax.broadcasted_iota(jnp.int32, (tm, t_pad), 0)
    bag_match = (bag_ids == row_iota).astype(jnp.bfloat16)    # (tm, t_pad)

    # Token one-hot mask (VPU iota + compare).  Ids >= vocab match nothing.
    lane_iota = lax.broadcasted_iota(jnp.int32, (t_pad, v_pad), 1)
    tok_onehot = (tok_ids == lane_iota).astype(jnp.bfloat16)  # (t_pad, v_pad)

    # Bag histogram: exact integer counts, f32 accumulation on the MXU.
    hist = jnp.dot(bag_match, tok_onehot,
                   preferred_element_type=jnp.float32)        # (tm, v_pad)

    # Bag lengths and mean normalization (EUP reciprocal; empty bag -> zeros).
    lengths = jnp.sum(hist, axis=-1, keepdims=True)           # (tm, 1)
    inv = jnp.where(lengths > 0.0, pl.reciprocal(lengths, approx=True), 0.0)

    # embedded = mean of embedding rows.  hist counts are exact in bf16 up to
    # 256 repeats of a single token id per bag (plenty here).
    embedded = jnp.dot(hist.astype(jnp.bfloat16), emb_ref[...],
                       preferred_element_type=jnp.float32) * inv   # (tm, d_pad) f32

    # 3-layer MLP: bf16 MXU operands, f32 accumulation, bias/ReLU in f32.
    h1 = jnp.maximum(
        jnp.dot(embedded.astype(jnp.bfloat16), w1_ref[...],
                preferred_element_type=jnp.float32) + b1_ref[...], 0.0)
    h2 = jnp.maximum(
        jnp.dot(h1.astype(jnp.bfloat16), w2_ref[...],
                preferred_element_type=jnp.float32) + b2_ref[...], 0.0)
    out_ref[...] = (
        jnp.dot(h2.astype(jnp.bfloat16), w3_ref[...],
                preferred_element_type=jnp.float32) + b3_ref[...])


# ------------------------------ JAX glue ------------------------------------
def init_params(key, vocab_size, embed_dim, num_class):
    """Mirror TextClassificationModel.init_weights(): U(-0.5, 0.5) weights, zero biases.
    Weights stored PyTorch-style [out, in], f32 masters."""
    k_emb, k1, k2, k3 = jax.random.split(key, 4)
    r = 0.5
    emb_w = jax.random.uniform(k_emb, (vocab_size, embed_dim), jnp.float32, -r, r)
    fc1_w = jax.random.uniform(k1, (64, embed_dim), jnp.float32, -r, r)
    fc2_w = jax.random.uniform(k2, (16, 64), jnp.float32, -r, r)
    fc3_w = jax.random.uniform(k3, (num_class, 16), jnp.float32, -r, r)
    return (emb_w, fc1_w, jnp.zeros((64,), jnp.float32),
            fc2_w, jnp.zeros((16,), jnp.float32),
            fc3_w, jnp.zeros((num_class,), jnp.float32))


def prepare_params(params):
    """Pad to kernel layout: table (v_pad, D) bf16 (no lane padding of the last dim),
    MLP weights [in, out] bf16 padded to 128 lanes, biases f32 (1, 128)."""
    emb_w, fc1_w, fc1_b, fc2_w, fc2_b, fc3_w, fc3_b = params
    V, D = emb_w.shape
    h1, h2, nc = fc1_w.shape[0], fc2_w.shape[0], fc3_w.shape[0]
    v_pad = _round_up(V, 128)          # vocab (sublane dim of table / hist lane dim)
    d_pad = _round_up(D, 16)           # bf16 sublane packing for the fc1 contraction

    def pad2(x, shape, dtype):
        out = jnp.zeros(shape, dtype)
        return out.at[:x.shape[0], :x.shape[1]].set(x.astype(dtype))

    emb_p = pad2(emb_w, (v_pad, d_pad), jnp.bfloat16)          # native-width last dim
    w1_p = pad2(fc1_w.T, (d_pad, LANES), jnp.bfloat16)         # [in, out] layout
    w2_p = pad2(fc2_w.T, (LANES, LANES), jnp.bfloat16)
    w3_p = pad2(fc3_w.T, (LANES, LANES), jnp.bfloat16)
    b1_p = jnp.zeros((1, LANES), jnp.float32).at[0, :h1].set(fc1_b)
    b2_p = jnp.zeros((1, LANES), jnp.float32).at[0, :h2].set(fc2_b)
    b3_p = jnp.zeros((1, LANES), jnp.float32).at[0, :nc].set(fc3_b)
    return emb_p, w1_p, b1_p, w2_p, b2_p, w3_p, b3_p


def model_forward(text, offsets, kparams, num_class, *, block_rows=128):
    emb_p, w1_p, b1_p, w2_p, b2_p, w3_p, b3_p = kparams
    T = int(text.shape[0])
    B = int(offsets.shape[0])
    v_pad, d_pad = emb_p.shape

    tm = min(block_rows, _round_up(max(B, 1), 8))   # rows (bags) per grid step
    b_pad = _round_up(B, tm)
    n_tiles = b_pad // tm
    t_pad = _round_up(max(T, 1), 128)

    # Bag id per token (PyTorch EmbeddingBag offsets convention); pad tokens get -1.
    pos = jnp.arange(T, dtype=jnp.int32)
    seg = (jnp.sum(pos[:, None] >= offsets[None, :].astype(jnp.int32), axis=1) - 1
           ).astype(jnp.int32)
    bag_row = jnp.full((1, t_pad), -1, jnp.int32).at[0, :T].set(seg)
    tok_col = jnp.zeros((t_pad, 1), jnp.int32).at[:T, 0].set(text.astype(jnp.int32))

    flops = int(2 * n_tiles * tm * t_pad * v_pad
                + 2 * b_pad * (v_pad * d_pad + d_pad * LANES + 2 * LANES * LANES))
    bytes_acc = int(tok_col.size * 4 + bag_row.size * 4 + emb_p.size * 2
                    + (w1_p.size + w2_p.size + w3_p.size) * 2
                    + (b1_p.size + b2_p.size + b3_p.size) * 4
                    + b_pad * LANES * 4)

    out = pl.pallas_call(
        text_clf_kernel,
        out_shape=jax.ShapeDtypeStruct((b_pad, LANES), jnp.float32),
        grid_spec=pltpu.PrefetchScalarGridSpec(
            num_scalar_prefetch=0,
            grid=(n_tiles,),
            in_specs=[
                pl.BlockSpec(tok_col.shape, lambda i: (0, 0)),
                pl.BlockSpec(bag_row.shape, lambda i: (0, 0)),
                pl.BlockSpec(emb_p.shape, lambda i: (0, 0)),
                pl.BlockSpec(w1_p.shape, lambda i: (0, 0)),
                pl.BlockSpec(b1_p.shape, lambda i: (0, 0)),
                pl.BlockSpec(w2_p.shape, lambda i: (0, 0)),
                pl.BlockSpec(b2_p.shape, lambda i: (0, 0)),
                pl.BlockSpec(w3_p.shape, lambda i: (0, 0)),
                pl.BlockSpec(b3_p.shape, lambda i: (0, 0)),
            ],
            out_specs=pl.BlockSpec((tm, LANES), lambda i: (i, 0)),
        ),
        compiler_params=pltpu.CompilerParams(
            dimension_semantics=("parallel",),
            vmem_limit_bytes=32 * 1024 * 1024),
        cost_estimate=pl.CostEstimate(flops=flops, transcendentals=int(b_pad),
                                      bytes_accessed=bytes_acc),
    )(tok_col, bag_row, emb_p, w1_p, b1_p, w2_p, b2_p, w3_p, b3_p)

    return out[:B, :num_class]


def reference_forward(text, offsets, params):
    """Pure-JAX reference mirroring the kernel numerics (bf16 operands, f32 accum)."""
    emb_w, fc1_w, fc1_b, fc2_w, fc2_b, fc3_w, fc3_b = params
    T = text.shape[0]
    B = offsets.shape[0]
    pos = jnp.arange(T)
    seg = jnp.sum(pos[:, None] >= offsets[None, :], axis=1) - 1          # bag id per token
    rows = emb_w.astype(jnp.bfloat16)[text].astype(jnp.float32)          # (T, D)
    sums = jax.ops.segment_sum(rows, seg, num_segments=B)
    lens = jax.ops.segment_sum(jnp.ones((T,), jnp.float32), seg, num_segments=B)
    embedded = sums * jnp.where(lens > 0, 1.0 / lens, 0.0)[:, None]

    def dense(x, w, b):
        return jnp.dot(x.astype(jnp.bfloat16), w.T.astype(jnp.bfloat16),
                       preferred_element_type=jnp.float32) + b

    x = jnp.maximum(dense(embedded, fc1_w, fc1_b), 0.0)
    x = jnp.maximum(dense(x, fc2_w, fc2_b), 0.0)
    return dense(x, fc3_w, fc3_b)


# --------------------------------- main --------------------------------------
if __name__ == "__main__":
    key = jax.random.PRNGKey(0)

    vocab_size = 50
    embed_dim = 32
    num_class = 4

    k_params, k_text1, k_text2 = jax.random.split(key, 3)
    params = init_params(k_params, vocab_size, embed_dim, num_class)
    kparams = prepare_params(params)

    # Test 1: batch=4 bags over 20 tokens (single grid step).
    text1 = jax.random.randint(k_text1, (20,), 0, vocab_size, dtype=jnp.int32)
    offsets1 = jnp.array([0, 5, 11, 16], dtype=jnp.int32)   # bags of length 5, 6, 5, 4
    out1 = jax.block_until_ready(model_forward(text1, offsets1, kparams, num_class))
    ref1 = reference_forward(text1, offsets1, params)
    assert out1.shape == (4, num_class)
    assert jnp.allclose(out1, ref1, atol=1e-2, rtol=1e-2), "mismatch vs reference (test 1)"

    # Test 2: batch=12 bags over 64 tokens with a small row tile -> multi-step grid
    # (exercises the batch-tiled out_spec and padded bags).
    text2 = jax.random.randint(k_text2, (64,), 0, vocab_size, dtype=jnp.int32)
    offsets2 = jnp.arange(12, dtype=jnp.int32) * 5
    out2 = jax.block_until_ready(
        model_forward(text2, offsets2, kparams, num_class, block_rows=8))
    ref2 = reference_forward(text2, offsets2, params)
    assert out2.shape == (12, num_class)
    assert jnp.allclose(out2, ref2, atol=1e-2, rtol=1e-2), "mismatch vs reference (test 2)"

    print("KERNEL_OK")
</pallas_src>

<mosaic_0001>
module attributes {stable_mosaic.version = 11 : i64} {
  func.func @text_clf_kernel(%arg0: i32, %arg1: memref<128x1xi32, #tpu.memory_space<vmem>>, %arg2: memref<1x128xi32, #tpu.memory_space<vmem>>, %arg3: memref<128x32xbf16, #tpu.memory_space<vmem>>, %arg4: memref<32x128xbf16, #tpu.memory_space<vmem>>, %arg5: memref<1x128xf32, #tpu.memory_space<vmem>>, %arg6: memref<128x128xbf16, #tpu.memory_space<vmem>>, %arg7: memref<1x128xf32, #tpu.memory_space<vmem>>, %arg8: memref<128x128xbf16, #tpu.memory_space<vmem>>, %arg9: memref<1x128xf32, #tpu.memory_space<vmem>>, %arg10: memref<8x128xf32, #tpu.memory_space<vmem>>) attributes {dimension_semantics = [#tpu.dimension_semantics<parallel>], iteration_bounds = array<i64: 1>, scalar_prefetch = 0 : i64, scratch_operands = 0 : i64, tpu.core_type = #tpu.core_type<tc>, window_params = [{pipeline_mode = #tpu.pipeline_mode<synchronous>, transform_indices = @transform_0, window_bounds = array<i64: 128, 1>}, {pipeline_mode = #tpu.pipeline_mode<synchronous>, transform_indices = @transform_1, window_bounds = array<i64: 1, 128>}, {pipeline_mode = #tpu.pipeline_mode<synchronous>, transform_indices = @transform_2, window_bounds = array<i64: 128, 32>}, {pipeline_mode = #tpu.pipeline_mode<synchronous>, transform_indices = @transform_3, window_bounds = array<i64: 32, 128>}, {pipeline_mode = #tpu.pipeline_mode<synchronous>, transform_indices = @transform_4, window_bounds = array<i64: 1, 128>}, {pipeline_mode = #tpu.pipeline_mode<synchronous>, transform_indices = @transform_5, window_bounds = array<i64: 128, 128>}, {pipeline_mode = #tpu.pipeline_mode<synchronous>, transform_indices = @transform_6, window_bounds = array<i64: 1, 128>}, {pipeline_mode = #tpu.pipeline_mode<synchronous>, transform_indices = @transform_7, window_bounds = array<i64: 128, 128>}, {pipeline_mode = #tpu.pipeline_mode<synchronous>, transform_indices = @transform_8, window_bounds = array<i64: 1, 128>}, {transform_indices = @transform_9, window_bounds = array<i64: 8, 128>}]} {
    %c8_i32 = arith.constant 8 : i32
    %0 = arith.muli %arg0, %c8_i32 : i32
    %c0 = arith.constant 0 : index
    %c0_0 = arith.constant 0 : index
    %1 = vector.load %arg2[%c0, %c0_0] : memref<1x128xi32, #tpu.memory_space<vmem>>, vector<1x128xi32>
    %c0_1 = arith.constant 0 : index
    %c0_2 = arith.constant 0 : index
    %2 = vector.load %arg1[%c0_1, %c0_2] : memref<128x1xi32, #tpu.memory_space<vmem>>, vector<128x1xi32>
    %3 = tpu.iota {dimensions = array<i32: 0>} : vector<8x128xi32>
    %4 = vector.broadcast %0 : i32 to vector<8x128xi32>
    %5 = arith.addi %4, %3 : vector<8x128xi32>
    %6 = vector.broadcast %1 : vector<1x128xi32> to vector<8x128xi32>
    %7 = arith.cmpi eq, %6, %5 : vector<8x128xi32>
    %8 = arith.extui %7 : vector<8x128xi1> to vector<8x128xi32>
    %9 = arith.sitofp %8 : vector<8x128xi32> to vector<8x128xf32>
    %10 = arith.truncf %9 : vector<8x128xf32> to vector<8x128xbf16>
    %11 = tpu.iota {dimensions = array<i32: 1>} : vector<128x128xi32>
    %12 = vector.broadcast %2 : vector<128x1xi32> to vector<128x128xi32>
    %13 = arith.cmpi eq, %12, %11 : vector<128x128xi32>
    %14 = arith.extui %13 : vector<128x128xi1> to vector<128x128xi32>
    %15 = arith.sitofp %14 : vector<128x128xi32> to vector<128x128xf32>
    %16 = arith.truncf %15 : vector<128x128xf32> to vector<128x128xbf16>
    %cst = arith.constant dense<0.000000e+00> : vector<8x128xf32>
    %17 = tpu.matmul %10, %16, %cst {dimension_numbers = #tpu.dot_dimension_numbers<[1], [0], [0], [1], [0, 0, 1, 1], [], []>} : vector<8x128xbf16>, vector<128x128xbf16>, vector<8x128xf32> -> vector<8x128xf32>
    %cst_3 = arith.constant dense<0.000000e+00> : vector<8xf32>
    %18 = vector.multi_reduction <add>, %17, %cst_3 [1] : vector<8x128xf32> to vector<8xf32>
    %19 = vector.shape_cast %18 : vector<8xf32> to vector<8x1xf32>
    %cst_4 = arith.constant 0.000000e+00 : f32
    %20 = vector.broadcast %cst_4 : f32 to vector<8x1xf32>
    %21 = arith.cmpf ogt, %19, %20 : vector<8x1xf32>
    %22 = tpu.reciprocal %19 {approx = true} : vector<8x1xf32> -> vector<8x1xf32>
    %cst_5 = arith.constant 0.000000e+00 : f32
    %23 = vector.broadcast %cst_5 : f32 to vector<8x1xf32>
    %24 = arith.select %21, %22, %23 : vector<8x1xi1>, vector<8x1xf32>
    %25 = arith.truncf %17 : vector<8x128xf32> to vector<8x128xbf16>
    %c0_6 = arith.constant 0 : index
    %c0_7 = arith.constant 0 : index
    %26 = vector.load %arg3[%c0_6, %c0_7] : memref<128x32xbf16, #tpu.memory_space<vmem>>, vector<128x32xbf16>
    %cst_8 = arith.constant dense<0.000000e+00> : vector<8x32xf32>
    %27 = tpu.matmul %25, %26, %cst_8 {dimension_numbers = #tpu.dot_dimension_numbers<[1], [0], [0], [1], [0, 0, 1, 1], [], []>} : vector<8x128xbf16>, vector<128x32xbf16>, vector<8x32xf32> -> vector<8x32xf32>
    %28 = vector.broadcast %24 : vector<8x1xf32> to vector<8x32xf32>
    %29 = arith.mulf %27, %28 : vector<8x32xf32>
    %30 = arith.truncf %29 : vector<8x32xf32> to vector<8x32xbf16>
    %c0_9 = arith.constant 0 : index
    %c0_10 = arith.constant 0 : index
    %31 = vector.load %arg4[%c0_9, %c0_10] : memref<32x128xbf16, #tpu.memory_space<vmem>>, vector<32x128xbf16>
    %cst_11 = arith.constant dense<0.000000e+00> : vector<8x128xf32>
    %32 = tpu.matmul %30, %31, %cst_11 {dimension_numbers = #tpu.dot_dimension_numbers<[1], [0], [0], [1], [0, 0, 1, 1], [], []>} : vector<8x32xbf16>, vector<32x128xbf16>, vector<8x128xf32> -> vector<8x128xf32>
    %c0_12 = arith.constant 0 : index
    %c0_13 = arith.constant 0 : index
    %33 = vector.load %arg5[%c0_12, %c0_13] : memref<1x128xf32, #tpu.memory_space<vmem>>, vector<1x128xf32>
    %34 = vector.broadcast %33 : vector<1x128xf32> to vector<8x128xf32>
    %35 = arith.addf %32, %34 : vector<8x128xf32>
    %cst_14 = arith.constant 0.000000e+00 : f32
    %36 = vector.broadcast %cst_14 : f32 to vector<8x128xf32>
    %37 = arith.maximumf %35, %36 : vector<8x128xf32>
    %38 = arith.truncf %37 : vector<8x128xf32> to vector<8x128xbf16>
    %c0_15 = arith.constant 0 : index
    %c0_16 = arith.constant 0 : index
    %39 = vector.load %arg6[%c0_15, %c0_16] : memref<128x128xbf16, #tpu.memory_space<vmem>>, vector<128x128xbf16>
    %cst_17 = arith.constant dense<0.000000e+00> : vector<8x128xf32>
    %40 = tpu.matmul %38, %39, %cst_17 {dimension_numbers = #tpu.dot_dimension_numbers<[1], [0], [0], [1], [0, 0, 1, 1], [], []>} : vector<8x128xbf16>, vector<128x128xbf16>, vector<8x128xf32> -> vector<8x128xf32>
    %c0_18 = arith.constant 0 : index
    %c0_19 = arith.constant 0 : index
    %41 = vector.load %arg7[%c0_18, %c0_19] : memref<1x128xf32, #tpu.memory_space<vmem>>, vector<1x128xf32>
    %42 = vector.broadcast %41 : vector<1x128xf32> to vector<8x128xf32>
    %43 = arith.addf %40, %42 : vector<8x128xf32>
    %cst_20 = arith.constant 0.000000e+00 : f32
    %44 = vector.broadcast %cst_20 : f32 to vector<8x128xf32>
    %45 = arith.maximumf %43, %44 : vector<8x128xf32>
    %46 = arith.truncf %45 : vector<8x128xf32> to vector<8x128xbf16>
    %c0_21 = arith.constant 0 : index
    %c0_22 = arith.constant 0 : index
    %47 = vector.load %arg8[%c0_21, %c0_22] : memref<128x128xbf16, #tpu.memory_space<vmem>>, vector<128x128xbf16>
    %cst_23 = arith.constant dense<0.000000e+00> : vector<8x128xf32>
    %48 = tpu.matmul %46, %47, %cst_23 {dimension_numbers = #tpu.dot_dimension_numbers<[1], [0], [0], [1], [0, 0, 1, 1], [], []>} : vector<8x128xbf16>, vector<128x128xbf16>, vector<8x128xf32> -> vector<8x128xf32>
    %c0_24 = arith.constant 0 : index
    %c0_25 = arith.constant 0 : index
    %49 = vector.load %arg9[%c0_24, %c0_25] : memref<1x128xf32, #tpu.memory_space<vmem>>, vector<1x128xf32>
    %50 = vector.broadcast %49 : vector<1x128xf32> to vector<8x128xf32>
    %51 = arith.addf %48, %50 : vector<8x128xf32>
    %c0_26 = arith.constant 0 : index
    %c0_27 = arith.constant 0 : index
    %52 = vector.load %arg10[%c0_26, %c0_27] : memref<8x128xf32, #tpu.memory_space<vmem>>, vector<8x128xf32>
    tpu.vector_store %arg10[%c0_26, %c0_27], %51 {strides = array<i32>} : memref<8x128xf32, #tpu.memory_space<vmem>>, vector<8x128xf32>,
    return
  }
  func.func @transform_0(%arg0: i32) -> (i32, i32) {
    %c0_i32 = arith.constant 0 : i32
    %c0_i32_0 = arith.constant 0 : i32
    %c0_i32_1 = arith.constant 0 : i32
    return %c0_i32, %c0_i32_0 : i32, i32
  }
  func.func @transform_1(%arg0: i32) -> (i32, i32) {
    %c0_i32 = arith.constant 0 : i32
    %c0_i32_0 = arith.constant 0 : i32
    %c0_i32_1 = arith.constant 0 : i32
    return %c0_i32, %c0_i32_0 : i32, i32
  }
  func.func @transform_2(%arg0: i32) -> (i32, i32) {
    %c0_i32 = arith.constant 0 : i32
    %c0_i32_0 = arith.constant 0 : i32
    %c0_i32_1 = arith.constant 0 : i32
    return %c0_i32, %c0_i32_0 : i32, i32
  }
  func.func @transform_3(%arg0: i32) -> (i32, i32) {
    %c0_i32 = arith.constant 0 : i32
    %c0_i32_0 = arith.constant 0 : i32
    %c0_i32_1 = arith.constant 0 : i32
    return %c0_i32, %c0_i32_0 : i32, i32
  }
  func.func @transform_4(%arg0: i32) -> (i32, i32) {
    %c0_i32 = arith.constant 0 : i32
    %c0_i32_0 = arith.constant 0 : i32
    %c0_i32_1 = arith.constant 0 : i32
    return %c0_i32, %c0_i32_0 : i32, i32
  }
  func.func @transform_5(%arg0: i32) -> (i32, i32) {
    %c0_i32 = arith.constant 0 : i32
    %c0_i32_0 = arith.constant 0 : i32
    %c0_i32_1 = arith.constant 0 : i32
    return %c0_i32, %c0_i32_0 : i32, i32
  }
  func.func @transform_6(%arg0: i32) -> (i32, i32) {
    %c0_i32 = arith.constant 0 : i32
    %c0_i32_0 = arith.constant 0 : i32
    %c0_i32_1 = arith.constant 0 : i32
    return %c0_i32, %c0_i32_0 : i32, i32
  }
  func.func @transform_7(%arg0: i32) -> (i32, i32) {
    %c0_i32 = arith.constant 0 : i32
    %c0_i32_0 = arith.constant 0 : i32
    %c0_i32_1 = arith.constant 0 : i32
    return %c0_i32, %c0_i32_0 : i32, i32
  }
  func.func @transform_8(%arg0: i32) -> (i32, i32) {
    %c0_i32 = arith.constant 0 : i32
    %c0_i32_0 = arith.constant 0 : i32
    %c0_i32_1 = arith.constant 0 : i32
    return %c0_i32, %c0_i32_0 : i32, i32
  }
  func.func @transform_9(%arg0: i32) -> (i32, i32) {
    %c0_i32 = arith.constant 0 : i32
    %c0_i32_0 = arith.constant 0 : i32
    return %arg0, %c0_i32 : i32, i32
  }
}

</mosaic_0001>

<bundles_post_ra>
// kernel: tpu_custom_call.1
= control target key start
LH: loop header
LB: loop body
LE: loop exit
PB: predicated region body
PF: predicated region fallthrough
CT: control target
= control target key end

     0   :  { %v880_v2 = vmov 0   ;;  %v881_v5 = vmov 0.0   ;;  %s1120_s0 = inlined_call_operand.vmem [shape: s32[128,1], index: 0, kind: input, shape index: {}]   ;;  %s1121_s1 = inlined_call_operand.vmem [shape: s32[1,128], index: 1, kind: input, shape index: {}]   ;;  %s1122_s2 = inlined_call_operand.vmem [shape: bf16[128,32], index: 2, kind: input, shape index: {}]   ;;  %s1123_s3 = inlined_call_operand.vmem [shape: bf16[32,128], index: 3, kind: input, shape index: {}]   ;;  %s1124_s4 = inlined_call_operand.vmem [shape: f32[1,128], index: 4, kind: input, shape index: {}]   ;;  %s1125_s5 = inlined_call_operand.vmem [shape: bf16[128,128], index: 5, kind: input, shape index: {}]   ;;  %s1126_s6 = inlined_call_operand.vmem [shape: f32[1,128], index: 6, kind: input, shape index: {}]   ;;  %s1127_s7 = inlined_call_operand.vmem [shape: bf16[128,128], index: 7, kind: input, shape index: {}]   ;;  %s1128_s8 = inlined_call_operand.vmem [shape: f32[1,128], index: 8, kind: input, shape index: {}]   ;;  %s1129_s9 = inlined_call_operand.hbm [shape: f32[8,128], index: 9, kind: output, shape index: {}]  }
   0x1   :  { %v50_v0 = vld [vmem:[%s1120_s0 + $0x70] sm:$0xff]  ;;  %v48_v1 = vld [vmem:[%s1120_s0 + $0x60] sm:$0xff]  ;;  %829 = vset.pattern.permute.xlu1 %v880_v2  ;;  %828 = vset.pattern.permute.xlu0 %v880_v2  ;;  %v51_v3 = vld [vmem:[%s1120_s0 + $0x78] sm:$0xff] }
   0x2   :  { %109 = vperm.xlu0 %828, %v50_v0   ;;  %103 = vperm.xlu1 %829, %v48_v1   ;;  %v49_v4 = vld [vmem:[%s1120_s0 + $0x68] sm:$0xff]  ;;  %v47_v6 = vld [vmem:[%s1120_s0 + $0x58] sm:$0xff]  ;;  %v46_v7 = vld [vmem:[%s1120_s0 + $0x50] sm:$0xff] }
   0x3   :  { %735 = vmatprep.subr.bf16.mxu0 %v881_v5  ;;  %755 = vmatprep.subr.bf16.mxu1 %v881_v5  ;;  %v45_v8 = vld [vmem:[%s1120_s0 + $0x48] sm:$0xff]  ;;  %v44_v9 = vld [vmem:[%s1120_s0 + $0x40] sm:$0xff]  ;;  %v43_v10 = vld [vmem:[%s1120_s0 + $0x38] sm:$0xff] }
   0x4   :  { %v42_v11 = vld [vmem:[%s1120_s0 + $0x30] sm:$0xff]  ;;  %v41_v12 = vld [vmem:[%s1120_s0 + $0x28] sm:$0xff]  ;;  %v40_v13 = vld [vmem:[%s1120_s0 + $0x20] sm:$0xff] }
   0x6   :  { %112 = vperm.xlu0 %828, %v51_v3   ;;  %106 = vperm.xlu1 %829, %v49_v4  }
   0xa   :  { %100 = vperm.xlu1 %829, %v47_v6   ;;  %97 = vperm.xlu0 %828, %v46_v7  }
   0xe   :  { %94 = vperm.xlu1 %829, %v45_v8   ;;  %91 = vperm.xlu0 %828, %v44_v9  }
  0x12   :  { %88 = vperm.xlu1 %829, %v43_v10   ;;  %85 = vperm.xlu0 %828, %v42_v11  }
  0x16   :  { %82 = vperm.xlu1 %829, %v41_v12   ;;  %79 = vperm.xlu0 %828, %v40_v13  }
  0x17   :  { %14 = vsyncpa [#allocation3], 0  ;;  %v39_v14 = vld [vmem:[%s1120_s0 + $0x18] sm:$0xff]  ;;  %v38_v15 = vld [vmem:[%s1120_s0 + $0x10] sm:$0xff]  ;;  %vm882_vm0 = vmmov 0   ;;  %v52_v25 = vlaneseq  ;;  %s884_s27 = smov [#allocation2]  }
  0x18   :  { %v37_v16 = vld [vmem:[%s1120_s0 + $0x8] sm:$0xff]  ;;  %v36_v17 = vld [vmem:[%s1120_s0] sm:$0xff]  ;;  %751 = vmatprep.mubr.msk.bf16.mxu0 %vm882_vm0, %v881_v5  ;;  %771 = vmatprep.mubr.msk.bf16.mxu1 %vm882_vm0, %v881_v5  ;;  %v830_v18 = vld [vmem:[%s1122_s2 + $0x38] sm:$0xff]   ;;  %v883_v31 = vmov 1.0|1.0   ;;  %s622_s28 = sshll.u32 %s884_s27, 4  ;;  %s623_s28 = int_to_ptr.vmem [resolvable:$true] %s622_s28 }
  0x19   :  { %756 = vmatpush3.bf16.msra.mxu1 %v830_v18  ;;  %v831_v19 = vld [vmem:[%s1122_s2 + $0x30] sm:$0xff]   ;;  %v832_v20 = vld [vmem:[%s1122_s2 + $0x28] sm:$0xff]   ;;  %v833_v21 = vld [vmem:[%s1122_s2 + $0x20] sm:$0xff]   ;;  %v65_v28 = vand.u32 127, %v52_v25  ;;  %v53_v44 = vshrl.u32 %v52_v25, 7  ;;  %p863_p1 = scmp.lt.s32.totalorder %s623_s28, %s623_s28 }
  0x1a   :  { %76 = vperm.xlu1 %829, %v39_v14   ;;  %73 = vperm.xlu0 %828, %v38_v15   ;;  %v834_v22 = vld [vmem:[%s1122_s2 + $0x18] sm:$0xff]   ;;  %v835_v23 = vld [vmem:[%s1122_s2 + $0x10] sm:$0xff]   ;;  %v836_v24 = vld [vmem:[%s1122_s2 + $0x8] sm:$0xff]  }
  0x1b   :  { %757 = vmatprep.subr.bf16.mxu1 %v881_v5  ;;  %v630_v45 = vld [vmem:[%s1121_s1] ss:$0 sm:$0xff]  ;;  %v838_v52 = vld [vmem:[%s1123_s3 + $0x8] sm:$0xff]   ;;  %v840_v54 = vld [vmem:[%s1125_s5 + $0x38] sm:$0xff]  }
  0x1c   :  { %v837_v46 = vld [vmem:[%s1122_s2] sm:$0xff]   ;;  %v841_v55 = vld [vmem:[%s1125_s5 + $0x30] sm:$0xff]   ;;  %v842_v56 = vld [vmem:[%s1125_s5 + $0x28] sm:$0xff]  }
  0x1d   :  { %758 = vmatpush3.bf16.msra.mxu1 %v831_v19  ;;  %v839_v53 = vld [vmem:[%s1123_s3] sm:$0xff]   ;;  %v844_v58 = vld [vmem:[%s1125_s5 + $0x18] sm:$0xff]   ;;  %v845_v59 = vld [vmem:[%s1125_s5 + $0x10] sm:$0xff]  }
  0x1e   :  { %70 = vperm.xlu1 %829, %v37_v16   ;;  %67 = vperm.xlu0 %828, %v36_v17   ;;  %v843_v57 = vld [vmem:[%s1125_s5 + $0x20] sm:$0xff]   ;;  %v846_v6 = vld [vmem:[%s1125_s5 + $0x8] sm:$0xff]   ;;  %v848_v8 = vld [vmem:[%s1127_s7 + $0x38] sm:$0xff]  }
  0x1f   :  { %759 = vmatprep.subr.bf16.mxu1 %v881_v5  ;;  %v847_v7 = vld [vmem:[%s1125_s5] sm:$0xff]   ;;  %v849_v9 = vld [vmem:[%s1127_s7 + $0x30] sm:$0xff]   ;;  %v850_v10 = vld [vmem:[%s1127_s7 + $0x28] sm:$0xff]  }
  0x20   :  { %v851_v11 = vld [vmem:[%s1127_s7 + $0x20] sm:$0xff]   ;;  %v852_v12 = vld [vmem:[%s1127_s7 + $0x18] sm:$0xff]   ;;  %v853_v13 = vld [vmem:[%s1127_s7 + $0x10] sm:$0xff]  }
  0x21   :  { %760 = vmatpush3.bf16.msra.mxu1 %v832_v20  ;;  %v674_v14 = vld [vmem:[%s1124_s4] ss:$0 sm:$0xff] }
  0x22   :  { %761 = vmatprep.subr.bf16.mxu1 %v881_v5 }
  0x25   :  { %762 = vmatpush3.bf16.msra.mxu1 %v833_v21 }
  0x26   :  { %763 = vmatprep.subr.bf16.mxu1 %v881_v5 }
  0x29   :  { %764 = vmatpush3.bf16.msra.mxu1 %v834_v22  ;;  %v854_v22 = vld [vmem:[%s1127_s7 + $0x8] sm:$0xff]  }
  0x2a   :  { %765 = vmatprep.subr.bf16.mxu1 %v881_v5 }
  0x2d   :  { %766 = vmatpush3.bf16.msra.mxu1 %v835_v23  ;;  %v855_v23 = vld [vmem:[%s1127_s7] sm:$0xff]  }
  0x2e   :  { %767 = vmatprep.subr.bf16.mxu1 %v881_v5 }
  0x31   :  { %768 = vmatpush3.bf16.msra.mxu1 %v836_v24  ;;  %v678_v24 = vld [vmem:[%s1126_s6] ss:$0 sm:$0xff]  ;;  %s858_s6 = scalar_lea.vmem %s623_s28, 128 }
  0x32   :  { %769 = vmatprep.subr.bf16.mxu1 %v881_v5  ;;  %p859_p0 = scmp.ne.s32.totalorder %s623_s28, %s858_s6  ;;  %p864_p2 = scmp.lt.s32.totalorder %s858_s6, %s858_s6 }
  0x34   :  { %p865_p3 = por %p864_p2, %p863_p1 }
  0x35   :  { %770 = vmatpush3.bf16.msra.mxu1 %v837_v46 }
  0x36   :  { %783 = vmatprep.subr.bf16.mxu1 %v881_v5  ;;  %p866_p4 = pnand %p865_p3, %p859_p0 }
  0x7d   :  { %v110_v26 = vpop.permute.xlu0 %109  ;;  %v104_v27 = vpop.permute.xlu1 %103 }
  0x7e   :  { %vm128_vm1 = vcmp.eq.s32.totalorder %v110_v26, %v65_v28  ;;  %vm126_vm4 = vcmp.eq.s32.totalorder %v104_v27, %v65_v28 }
  0x81   :  { %v113_v29 = vpop.permute.xlu0 %112  ;;  %v107_v30 = vpop.permute.xlu1 %106 }
  0x82   :  { %vm129_vm2 = vcmp.eq.s32.totalorder %v113_v29, %v65_v28  ;;  %vm127_vm5 = vcmp.eq.s32.totalorder %v107_v30, %v65_v28 }
  0x83   :  { %vm648_vm3 = vmpackc.low %vm129_vm2, %vm128_vm1 }
  0x84   :  { %736 = vmatpush3.bf16.msk.msra.mxu0 %vm648_vm3, %v883_v31  ;;  %vm650_vm6 = vmpackc.low %vm127_vm5, %vm126_vm4 }
  0x85   :  { %v101_v32 = vpop.permute.xlu1 %100  ;;  %v98_v33 = vpop.permute.xlu0 %97  ;;  %737 = vmatprep.subr.bf16.mxu0 %v881_v5 }
  0x86   :  { %vm125_vm7 = vcmp.eq.s32.totalorder %v101_v32, %v65_v28  ;;  %vm124_vm8 = vcmp.eq.s32.totalorder %v98_v33, %v65_v28 }
  0x87   :  { %vm652_vm9 = vmpackc.low %vm125_vm7, %vm124_vm8 }
  0x88   :  { %738 = vmatpush3.bf16.msk.msra.mxu0 %vm650_vm6, %v883_v31 }
  0x89   :  { %v95_v34 = vpop.permute.xlu1 %94  ;;  %v92_v35 = vpop.permute.xlu0 %91  ;;  %739 = vmatprep.subr.bf16.mxu0 %v881_v5 }
  0x8a   :  { %vm123_vm10 = vcmp.eq.s32.totalorder %v95_v34, %v65_v28  ;;  %vm122_vm11 = vcmp.eq.s32.totalorder %v92_v35, %v65_v28 }
  0x8b   :  { %vm654_vm12 = vmpackc.low %vm123_vm10, %vm122_vm11 }
  0x8c   :  { %740 = vmatpush3.bf16.msk.msra.mxu0 %vm652_vm9, %v883_v31  ;;  %vm60_vm9 = vcmp.eq.s32.totalorder %v630_v45, %v53_v44 }
  0x8d   :  { %v89_v36 = vpop.permute.xlu1 %88  ;;  %v86_v37 = vpop.permute.xlu0 %85  ;;  %741 = vmatprep.subr.bf16.mxu0 %v881_v5  ;;  %vm664_vm11 = vmpackc.low %vm60_vm9, %vm60_vm9 }
  0x8e   :  { %vm121_vm13 = vcmp.eq.s32.totalorder %v89_v36, %v65_v28  ;;  %vm120_vm14 = vcmp.eq.s32.totalorder %v86_v37, %v65_v28 }
  0x8f   :  { %vm656_vm15 = vmpackc.low %vm121_vm13, %vm120_vm14  ;;  %vm345_vm13 = vcmask 261120  }
  0x90   :  { %742 = vmatpush3.bf16.msk.msra.mxu0 %vm654_vm12, %v883_v31 }
  0x91   :  { %v83_v38 = vpop.permute.xlu1 %82  ;;  %v80_v39 = vpop.permute.xlu0 %79  ;;  %743 = vmatprep.subr.bf16.mxu0 %v881_v5 }
  0x92   :  { %vm119_vm1 = vcmp.eq.s32.totalorder %v83_v38, %v65_v28  ;;  %vm118_vm2 = vcmp.eq.s32.totalorder %v80_v39, %v65_v28 }
  0x93   :  { %vm658_vm3 = vmpackc.low %vm119_vm1, %vm118_vm2 }
  0x94   :  { %744 = vmatpush3.bf16.msk.msra.mxu0 %vm656_vm15, %v883_v31 }
  0x95   :  { %v77_v40 = vpop.permute.xlu1 %76  ;;  %v74_v41 = vpop.permute.xlu0 %73  ;;  %745 = vmatprep.subr.bf16.mxu0 %v881_v5 }
  0x96   :  { %vm117_vm4 = vcmp.eq.s32.totalorder %v77_v40, %v65_v28  ;;  %vm116_vm5 = vcmp.eq.s32.totalorder %v74_v41, %v65_v28 }
  0x97   :  { %vm660_vm6 = vmpackc.low %vm117_vm4, %vm116_vm5 }
  0x98   :  { %746 = vmatpush3.bf16.msk.msra.mxu0 %vm658_vm3, %v883_v31 }
  0x99   :  { %v71_v42 = vpop.permute.xlu1 %70  ;;  %v68_v43 = vpop.permute.xlu0 %67  ;;  %747 = vmatprep.subr.bf16.mxu0 %v881_v5 }
  0x9a   :  { %vm115_vm7 = vcmp.eq.s32.totalorder %v71_v42, %v65_v28  ;;  %vm114_vm8 = vcmp.eq.s32.totalorder %v68_v43, %v65_v28 }
  0x9b   :  { %vm662_vm10 = vmpackc.low %vm115_vm7, %vm114_vm8 }
  0x9c   :  { %748 = vmatpush3.bf16.msk.msra.mxu0 %vm660_vm6, %v883_v31 }
  0x9d   :  { %749 = vmatprep.subr.bf16.mxu0 %v881_v5 }
  0xa0   :  { %750 = vmatpush3.bf16.msk.msra.mxu0 %vm662_vm10, %v883_v31 }
  0xa1   :  { %775 = vmatprep.subr.bf16.mxu0 %v881_v5 }
  0xa3   :  { %752 = vmatmul.mubr.msk.bf16.vlgmr.msra.gmra.mxu0 %vm664_vm11, %v883_v31 }
  0xa4   :  { %779 = vmatprep.mubr.msk.bf16.mxu0 %vm882_vm0, %v881_v5  ;;  %776 = vmatpush3.bf16.msra.mxu0 %v838_v52 }
  0xa5   :  { %777 = vmatprep.subr.bf16.mxu0 %v881_v5 }
  0xa8   :  { %778 = vmatpush3.bf16.msra.mxu0 %v839_v53 }
  0xa9   :  { %803 = vmatprep.subr.bf16.mxu0 %v881_v5 }
 0x163   :  { %v204_v47 = vpop.f32.mrf.mxu0 }
 0x164   :  { %v215_v48 = vpack.c.bf16 %v204_v47, %v204_v47  ;;  %210 = vadd.xlane.f32.xlu0 %v204_v47 }
 0x165   :  { %v753_v49 = vpop.f32.mrf.mxu0 }
 0x166   :  { %772 = vmatmul.mubr.bf16.vlgmr.msra.gmra.mxu1 %v215_v48 }
 0x167   :  { %v207_v50 = vpop.f32.mrf.mxu0  ;;  %799 = vmatprep.mubr.msk.bf16.mxu1 %vm882_vm0, %v881_v5  ;;  %784 = vmatpush3.bf16.msra.mxu1 %v840_v54 }
 0x168   :  { %785 = vmatprep.subr.bf16.mxu1 %v881_v5 }
 0x169   :  { %v754_v51 = vpop.f32.mrf.mxu0 }
 0x16b   :  { %786 = vmatpush3.bf16.msra.mxu1 %v841_v55 }
 0x16c   :  { %787 = vmatprep.subr.bf16.mxu1 %v881_v5 }
 0x16f   :  { %788 = vmatpush3.bf16.msra.mxu1 %v842_v56 }
 0x170   :  { %789 = vmatprep.subr.bf16.mxu1 %v881_v5 }
 0x173   :  { %790 = vmatpush3.bf16.msra.mxu1 %v843_v57 }
 0x174   :  { %791 = vmatprep.subr.bf16.mxu1 %v881_v5 }
 0x177   :  { %792 = vmatpush3.bf16.msra.mxu1 %v844_v58 }
 0x178   :  { %793 = vmatprep.subr.bf16.mxu1 %v881_v5 }
 0x17b   :  { %794 = vmatpush3.bf16.msra.mxu1 %v845_v59 }
 0x17c   :  { %795 = vmatprep.subr.bf16.mxu1 %v881_v5 }
 0x17f   :  { %796 = vmatpush3.bf16.msra.mxu1 %v846_v6 }
 0x180   :  { %797 = vmatprep.subr.bf16.mxu1 %v881_v5 }
 0x183   :  { %798 = vmatpush3.bf16.msra.mxu1 %v847_v7 }
 0x1ed   :  { %v211_v60 = vpop.xlane.xlu0 %210 }
 0x1ee   :  { %856 = vrcp.f32 %v211_v60  ;;  %vm212_vm12 = vcmp.gt.f32.partialorder %v211_v60, 0.0 }
 0x1fb   :  { %v857_v61 = vpop.eup %856 }
 0x1fc   :  { %v214_v62 = vsel %vm212_vm12, %v857_v61, 0.0 }
 0x226   :  { %v314_v63 = vpop.f32.mrf.mxu1 }
 0x227   :  { %v320_v0 = vmul.f32 %v314_v63, %v214_v62 }
 0x228   :  { %v773_v1 = vpop.f32.mrf.mxu1 }
 0x229   :  { %v321_v2 = vpack.c.bf16 %v320_v0, %v320_v0 }
 0x22a   :  { %v317_v3 = vpop.f32.mrf.mxu1 }
 0x22b   :  { %780 = vmatmul.mubr.msk.bf16.vlgmr.msra.gmra.mxu0 %vm345_vm13, %v321_v2 }
 0x22c   :  { %v774_v4 = vpop.f32.mrf.mxu1  ;;  %819 = vmatprep.mubr.msk.bf16.mxu0 %vm882_vm0, %v881_v5  ;;  %804 = vmatpush3.bf16.msra.mxu0 %v848_v8 }
 0x22d   :  { %805 = vmatprep.subr.bf16.mxu0 %v881_v5 }
 0x230   :  { %806 = vmatpush3.bf16.msra.mxu0 %v849_v9 }
 0x231   :  { %807 = vmatprep.subr.bf16.mxu0 %v881_v5 }
 0x234   :  { %808 = vmatpush3.bf16.msra.mxu0 %v850_v10 }
 0x235   :  { %809 = vmatprep.subr.bf16.mxu0 %v881_v5 }
 0x238   :  { %810 = vmatpush3.bf16.msra.mxu0 %v851_v11 }
 0x239   :  { %811 = vmatprep.subr.bf16.mxu0 %v881_v5 }
 0x23c   :  { %812 = vmatpush3.bf16.msra.mxu0 %v852_v12 }
 0x23d   :  { %813 = vmatprep.subr.bf16.mxu0 %v881_v5 }
 0x240   :  { %814 = vmatpush3.bf16.msra.mxu0 %v853_v13 }
 0x241   :  { %815 = vmatprep.subr.bf16.mxu0 %v881_v5 }
 0x244   :  { %816 = vmatpush3.bf16.msra.mxu0 %v854_v22 }
 0x245   :  { %817 = vmatprep.subr.bf16.mxu0 %v881_v5  ;;  %v687_v5 = vld [vmem:[%s1128_s8] ss:$0 sm:$0xff] }
 0x248   :  { %818 = vmatpush3.bf16.msra.mxu0 %v855_v23 }
 0x2eb   :  { %v383_v15 = vpop.f32.mrf.mxu0 }
 0x2ec   :  { %v384_v16 = vadd.f32 %v674_v14, %v383_v15 }
 0x2ed   :  { %v781_v17 = vpop.f32.mrf.mxu0 }
 0x2ee   :  { %v389_v18 = vmax.f32 %v384_v16, 0.0 }
 0x2ef   :  { %v386_v19 = vpop.f32.mrf.mxu0 }
 0x2f0   :  { %v390_v20 = vpack.c.bf16 %v389_v18, %v389_v18 }
 0x2f1   :  { %v782_v21 = vpop.f32.mrf.mxu0 }
 0x2f2   :  { %800 = vmatmul.mubr.bf16.vlgmr.msra.gmra.mxu1 %v390_v20 }
 0x3b2   :  { %v496_v25 = vpop.f32.mrf.mxu1 }
 0x3b3   :  { %v497_v26 = vadd.f32 %v678_v24, %v496_v25 }
 0x3b4   :  { %v801_v27 = vpop.f32.mrf.mxu1 }
 0x3b5   :  { %v502_v28 = vmax.f32 %v497_v26, 0.0 }
 0x3b6   :  { %v499_v29 = vpop.f32.mrf.mxu1 }
 0x3b7   :  { %v503_v30 = vpack.c.bf16 %v502_v28, %v502_v28 }
 0x3b8   :  { %v802_v31 = vpop.f32.mrf.mxu1 }
 0x3b9   :  { %820 = vmatmul.mubr.bf16.vlgmr.msra.gmra.mxu0 %v503_v30 }
 0x479   :  { %v609_v32 = vpop.f32.mrf.mxu0 }
 0x47a   :  { %v610_v33 = vadd.f32 %v687_v5, %v609_v32 }
 0x47b   :  { %v821_v34 = vpop.f32.mrf.mxu0 }
 0x47c   :  { %615 = vst [vmem:[#allocation2] sm:$0xff] %v610_v33 }
 0x47d   :  { %v612_v35 = vpop.f32.mrf.mxu0 }
 0x47e   :  { %869 = shalt.err (!%p866_p4)
}
 0x47f   :  { %625 = dma.vmem_to_hbm [thread:$0]  %s623_s28, 128, %s1129_s9, [#allocation3]   ;;  %v822_v36 = vpop.f32.mrf.mxu0 }
 0x480   :  { %878 = dma.done.wait [#allocation3], 128  }
 0x481   :  { %879 = vsyncadd [#allocation3], 4294967168 }
 0x482   :  { %629 = vsyncpa [#allocation3], 1 }

</bundles_post_ra>
